<compile_context>
chip_gen: v6e
topology: v6e:2x2x1
jax: 0.10.0
libtpu: 0.0.40
codegen_flags: <defaults>
</compile_context>

<pallas_src>
import functools

import jax
import jax.numpy as jnp
from jax.experimental import pallas as pl
from jax.experimental.pallas import tpu as pltpu

G_IN = 10
G_OUT = 10
H_DIM = 100
# nn.LeakyReLU(True): True binds to negative_slope -> slope 1.0 (identity).
# TODO(synk): set to 0.01 if the author actually meant LeakyReLU(inplace=True).
NEG_SLOPE = 1.0


def _round_up(x, m):
    return (x + m - 1) // m * m


def _num_tensorcores():
    """2 on v7x (megacore grid sharding helps), 1 on v5e/v6e."""
    try:
        kind = jax.devices()[0].device_kind.lower()
    except Exception:
        return 1
    return 2 if "v7" in kind else 1


def _pick_tile(n, max_tile, n_tc):
    # One maximal sublane-aligned tile when the batch fits ...
    tile = min(max_tile, _round_up(n, 128))
    # ... but on a 2-TC chip keep >= n_tc grid steps (each >= 128 rows) so the
    # "parallel" grid axis can be sharded across both cores.  Never over-split
    # on single-TC chips: that only doubles the fixed per-step overhead.
    if n_tc > 1 and n >= n_tc * 128:
        tile = min(tile, _round_up(pl.cdiv(n, n_tc), 128))
    return max(tile, 128)


def _generator_kernel(x_ref, w1_ref, b1_ref, w2_ref, b2_ref, o_ref):
    """One batch tile: y = leaky_relu(x @ W1 + b1) @ W2 + b2.

    x_ref : (tile_n, G_IN)
    w1_ref: (G_IN, H_DIM)    b1_ref: (1, H_DIM)
    w2_ref: (H_DIM, G_OUT)   b2_ref: (1, G_OUT)
    o_ref : (tile_n, G_OUT)
    """
    h = jnp.dot(x_ref[...], w1_ref[...], preferred_element_type=jnp.float32)
    h = h + b1_ref[...]
    h = jnp.where(h >= 0, h, NEG_SLOPE * h)     # identity for NEG_SLOPE == 1.0
    y = jnp.dot(h, w2_ref[...], preferred_element_type=jnp.float32)
    o_ref[...] = (y + b2_ref[...]).astype(o_ref.dtype)


def _generator_pallas(z, w1, b1, w2, b2, max_tile):
    n, d_in = z.shape
    assert d_in == G_IN
    tile_n = _pick_tile(n, max_tile, _num_tensorcores())
    grid = (pl.cdiv(n, tile_n),)

    return pl.pallas_call(
        _generator_kernel,
        out_shape=jax.ShapeDtypeStruct((n, G_OUT), jnp.float32),
        grid_spec=pltpu.PrefetchScalarGridSpec(
            num_scalar_prefetch=0,
            grid=grid,
            in_specs=[
                pl.BlockSpec((tile_n, G_IN), lambda i: (i, 0)),   # z batch tile
                pl.BlockSpec((G_IN, H_DIM), lambda i: (0, 0)),    # W1 (full)
                pl.BlockSpec((1, H_DIM), lambda i: (0, 0)),       # b1 (full)
                pl.BlockSpec((H_DIM, G_OUT), lambda i: (0, 0)),   # W2 (full)
                pl.BlockSpec((1, G_OUT), lambda i: (0, 0)),       # b2 (full)
            ],
            out_specs=pl.BlockSpec((tile_n, G_OUT), lambda i: (i, 0)),
        ),
        compiler_params=pltpu.CompilerParams(
            dimension_semantics=("parallel",),
            vmem_limit_bytes=32 * 1024 * 1024,
        ),
    )(z, w1, b1, w2, b2)


def reference_forward(z, w1, b1, w2, b2):
    """Plain-XLA two-layer reference (activation kept explicit)."""
    h = z @ w1 + b1
    h = jnp.where(h >= 0, h, NEG_SLOPE * h)
    return h @ w2 + b2


@functools.partial(jax.jit, static_argnames=("max_tile",))
def generator_pallas(z, w1, b1, w2, b2, *, max_tile=4096):
    """Forward pass, always through the Pallas kernel."""
    return _generator_pallas(z, w1, b1, w2, b2, max_tile)


@functools.partial(jax.jit, static_argnames=("max_tile", "min_pallas_batch"))
def generator_forward(z, w1, b1, w2, b2, *, max_tile=4096, min_pallas_batch=512):
    """z: (N, G_IN) f32 -> (N, G_OUT) f32, matching Generator.forward."""
    if z.shape[0] < min_pallas_batch:
        # Tiny-batch regime is pure dispatch overhead: one fused XLA affine
        # map beats an extra pallas_call dispatch.  The Pallas path remains
        # available (and is tested) via generator_pallas.
        return reference_forward(z, w1, b1, w2, b2)
    return _generator_pallas(z, w1, b1, w2, b2, max_tile)


def init_params(key):
    """Deterministic PyTorch-style uniform init; weights stored as (in, out)."""
    k1, k2, k3, k4 = jax.random.split(key, 4)
    bound1 = 1.0 / (G_IN ** 0.5)
    bound2 = 1.0 / (H_DIM ** 0.5)
    w1 = jax.random.uniform(k1, (G_IN, H_DIM), jnp.float32, -bound1, bound1)
    b1 = jax.random.uniform(k2, (1, H_DIM), jnp.float32, -bound1, bound1)
    w2 = jax.random.uniform(k3, (H_DIM, G_OUT), jnp.float32, -bound2, bound2)
    b2 = jax.random.uniform(k4, (1, G_OUT), jnp.float32, -bound2, bound2)
    return w1, b1, w2, b2


if __name__ == "__main__":
    key = jax.random.PRNGKey(0)
    kz1, kz2, kp = jax.random.split(key, 3)
    w1, b1, w2, b2 = init_params(kp)

    # 1) Small batch, forced through the Pallas kernel (single partial
    #    128-row boundary block, no wrapper-side pad/slice/transpose).
    z_small = jax.random.normal(kz1, (16, G_IN), jnp.float32)
    out_small = jax.block_until_ready(generator_pallas(z_small, w1, b1, w2, b2))
    ref_small = reference_forward(z_small, w1, b1, w2, b2)
    assert out_small.shape == (16, G_OUT)
    assert jnp.allclose(out_small, ref_small, atol=1e-4, rtol=1e-4), "small-batch mismatch"

    # 2) Larger, non-divisible batch through the default dispatch: Pallas path
    #    with a ragged tail handled by the partial last block.
    z_big = jax.random.normal(kz2, (1543, G_IN), jnp.float32)
    out_big = jax.block_until_ready(generator_forward(z_big, w1, b1, w2, b2))
    ref_big = reference_forward(z_big, w1, b1, w2, b2)
    assert out_big.shape == (1543, G_OUT)
    assert jnp.allclose(out_big, ref_big, atol=1e-4, rtol=1e-4), "large-batch mismatch"

    print("KERNEL_OK")
</pallas_src>

<mosaic_0001>
module attributes {stable_mosaic.version = 11 : i64} {
  func.func @_generator_kernel(%arg0: i32, %arg1: memref<128x10xf32, #tpu.memory_space<vmem>>, %arg2: memref<10x100xf32, #tpu.memory_space<vmem>>, %arg3: memref<1x100xf32, #tpu.memory_space<vmem>>, %arg4: memref<100x10xf32, #tpu.memory_space<vmem>>, %arg5: memref<1x10xf32, #tpu.memory_space<vmem>>, %arg6: memref<128x10xf32, #tpu.memory_space<vmem>>) attributes {dimension_semantics = [#tpu.dimension_semantics<parallel>], iteration_bounds = array<i64: 1>, scalar_prefetch = 0 : i64, scratch_operands = 0 : i64, tpu.core_type = #tpu.core_type<tc>, window_params = [{transform_indices = @transform_0, window_bounds = array<i64: 128, 10>}, {pipeline_mode = #tpu.pipeline_mode<synchronous>, transform_indices = @transform_1, window_bounds = array<i64: 10, 100>}, {pipeline_mode = #tpu.pipeline_mode<synchronous>, transform_indices = @transform_2, window_bounds = array<i64: 1, 100>}, {pipeline_mode = #tpu.pipeline_mode<synchronous>, transform_indices = @transform_3, window_bounds = array<i64: 100, 10>}, {pipeline_mode = #tpu.pipeline_mode<synchronous>, transform_indices = @transform_4, window_bounds = array<i64: 1, 10>}, {transform_indices = @transform_5, window_bounds = array<i64: 128, 10>}]} {
    %c0 = arith.constant 0 : index
    %c0_0 = arith.constant 0 : index
    %0 = vector.load %arg1[%c0, %c0_0] : memref<128x10xf32, #tpu.memory_space<vmem>>, vector<128x10xf32>
    %c0_1 = arith.constant 0 : index
    %c0_2 = arith.constant 0 : index
    %1 = vector.load %arg2[%c0_1, %c0_2] : memref<10x100xf32, #tpu.memory_space<vmem>>, vector<10x100xf32>
    %cst = arith.constant dense<0.000000e+00> : vector<128x100xf32>
    %2 = tpu.matmul %0, %1, %cst {dimension_numbers = #tpu.dot_dimension_numbers<[1], [0], [0], [1], [0, 0, 1, 1], [], []>} : vector<128x10xf32>, vector<10x100xf32>, vector<128x100xf32> -> vector<128x100xf32>
    %c0_3 = arith.constant 0 : index
    %c0_4 = arith.constant 0 : index
    %3 = vector.load %arg3[%c0_3, %c0_4] : memref<1x100xf32, #tpu.memory_space<vmem>>, vector<1x100xf32>
    %4 = vector.broadcast %3 : vector<1x100xf32> to vector<128x100xf32>
    %5 = arith.addf %2, %4 : vector<128x100xf32>
    %cst_5 = arith.constant 0.000000e+00 : f32
    %6 = vector.broadcast %cst_5 : f32 to vector<128x100xf32>
    %7 = arith.cmpf oge, %5, %6 : vector<128x100xf32>
    %cst_6 = arith.constant 1.000000e+00 : f32
    %8 = vector.broadcast %cst_6 : f32 to vector<128x100xf32>
    %9 = arith.mulf %8, %5 : vector<128x100xf32>
    %10 = arith.select %7, %5, %9 : vector<128x100xi1>, vector<128x100xf32>
    %c0_7 = arith.constant 0 : index
    %c0_8 = arith.constant 0 : index
    %11 = vector.load %arg4[%c0_7, %c0_8] : memref<100x10xf32, #tpu.memory_space<vmem>>, vector<100x10xf32>
    %cst_9 = arith.constant dense<0.000000e+00> : vector<128x10xf32>
    %12 = tpu.matmul %10, %11, %cst_9 {dimension_numbers = #tpu.dot_dimension_numbers<[1], [0], [0], [1], [0, 0, 1, 1], [], []>} : vector<128x100xf32>, vector<100x10xf32>, vector<128x10xf32> -> vector<128x10xf32>
    %c0_10 = arith.constant 0 : index
    %c0_11 = arith.constant 0 : index
    %13 = vector.load %arg5[%c0_10, %c0_11] : memref<1x10xf32, #tpu.memory_space<vmem>>, vector<1x10xf32>
    %14 = vector.broadcast %13 : vector<1x10xf32> to vector<128x10xf32>
    %15 = arith.addf %12, %14 : vector<128x10xf32>
    %c0_12 = arith.constant 0 : index
    %c0_13 = arith.constant 0 : index
    %16 = vector.load %arg6[%c0_12, %c0_13] : memref<128x10xf32, #tpu.memory_space<vmem>>, vector<128x10xf32>
    tpu.vector_store %arg6[%c0_12, %c0_13], %15 {strides = array<i32>} : memref<128x10xf32, #tpu.memory_space<vmem>>, vector<128x10xf32>,
    return
  }
  func.func @transform_0(%arg0: i32) -> (i32, i32) {
    %c0_i32 = arith.constant 0 : i32
    %c0_i32_0 = arith.constant 0 : i32
    return %arg0, %c0_i32 : i32, i32
  }
  func.func @transform_1(%arg0: i32) -> (i32, i32) {
    %c0_i32 = arith.constant 0 : i32
    %c0_i32_0 = arith.constant 0 : i32
    %c0_i32_1 = arith.constant 0 : i32
    return %c0_i32, %c0_i32_0 : i32, i32
  }
  func.func @transform_2(%arg0: i32) -> (i32, i32) {
    %c0_i32 = arith.constant 0 : i32
    %c0_i32_0 = arith.constant 0 : i32
    %c0_i32_1 = arith.constant 0 : i32
    return %c0_i32, %c0_i32_0 : i32, i32
  }
  func.func @transform_3(%arg0: i32) -> (i32, i32) {
    %c0_i32 = arith.constant 0 : i32
    %c0_i32_0 = arith.constant 0 : i32
    %c0_i32_1 = arith.constant 0 : i32
    return %c0_i32, %c0_i32_0 : i32, i32
  }
  func.func @transform_4(%arg0: i32) -> (i32, i32) {
    %c0_i32 = arith.constant 0 : i32
    %c0_i32_0 = arith.constant 0 : i32
    %c0_i32_1 = arith.constant 0 : i32
    return %c0_i32, %c0_i32_0 : i32, i32
  }
  func.func @transform_5(%arg0: i32) -> (i32, i32) {
    %c0_i32 = arith.constant 0 : i32
    %c0_i32_0 = arith.constant 0 : i32
    return %arg0, %c0_i32 : i32, i32
  }
}

</mosaic_0001>

<bundles_post_ra>
// kernel: generator_pallas.1
= control target key start
LH: loop header
LB: loop body
LE: loop exit
PB: predicated region body
PF: predicated region fallthrough
CT: control target
= control target key end

     0   :  { %10 = vsyncpa [#allocation3], 0  ;;  %vm95_vm0 = vcmask 1041408   ;;  %vm46_vm1 = vcmask 80896   ;;  %vm313_vm2 = vcmask 1043456   ;;  %vm264_vm3 = vcmask 818176   ;;  %s889_s0 = inlined_call_operand.vmem [shape: f32[16,10], index: 0, kind: input, shape index: {}]   ;;  %s890_s1 = inlined_call_operand.vmem [shape: f32[10,100], index: 1, kind: input, shape index: {}]   ;;  %s891_s2 = inlined_call_operand.vmem [shape: f32[1,100], index: 2, kind: input, shape index: {}]   ;;  %s892_s3 = inlined_call_operand.vmem [shape: f32[100,10], index: 3, kind: input, shape index: {}]   ;;  %s893_s4 = inlined_call_operand.vmem [shape: f32[1,10], index: 4, kind: input, shape index: {}]   ;;  %s894_s5 = inlined_call_operand.hbm [shape: f32[16,10], index: 5, kind: output, shape index: {}]  }
   0x1   :  { %v38_v0 = vld [vmem:[%s890_s1 + $0x8] sm:$0x3]  ;;  %v37_v1 = vld [vmem:[%s890_s1] sm:$0xff]  ;;  %v23_v4 = vld [vmem:[%s889_s0 + $0x10] sm:$0xff] }
   0x2   :  { %577 = vmatprep.subr.msk.mxu0 %vm95_vm0, %v38_v0  ;;  %v21_v2 = vld [vmem:[%s889_s0] sm:$0xff]  ;;  %v22_v3 = vld [vmem:[%s889_s0 + $0x8] sm:$0xff]  ;;  %v24_v5 = vld [vmem:[%s889_s0 + $0x18] sm:$0xff] }
   0x3   :  { %578 = vmatpush3.msk.msra.mxu0 %vm95_vm0, %v38_v0  ;;  %581 = vmatprep.mubr.msk.f32.mxu0 %vm46_vm1, %v21_v2  ;;  %v256_v6 = vld [vmem:[%s892_s3 + $0x60] sm:$0xf]  ;;  %v255_v7 = vld [vmem:[%s892_s3 + $0x58] sm:$0xff]  ;;  %v254_v9 = vld [vmem:[%s892_s3 + $0x50] sm:$0xff] }
   0x4   :  { %579 = vmatprep.subr.mxu0 %v37_v1  ;;  %v25_v8 = vld [vmem:[%s889_s0 + $0x20] sm:$0xff]  ;;  %655 = vmatprep.subr.msk.mxu1 %vm313_vm2, %v256_v6  ;;  %v26_v10 = vld [vmem:[%s889_s0 + $0x28] sm:$0xff]  ;;  %v27_v12 = vld [vmem:[%s889_s0 + $0x30] sm:$0xff] }
   0x5   :  { %580 = vmatpush3.msra.mxu0 %v37_v1  ;;  %668 = vmatpush3.msk.msra.mxu1 %vm313_vm2, %v256_v6  ;;  %v253_v11 = vld [vmem:[%s892_s3 + $0x48] sm:$0xff]  ;;  %v252_v13 = vld [vmem:[%s892_s3 + $0x40] sm:$0xff]  ;;  %v28_v14 = vld [vmem:[%s889_s0 + $0x38] sm:$0xff] }
   0x6   :  { %582 = vmatmul.mubr.msk.f32.vlgmr.msra.gmra.mxu0 %vm46_vm1, %v22_v3  ;;  %605 = vmatprep.subr.msk.mxu0 %vm313_vm2, %v256_v6  ;;  %v251_v15 = vld [vmem:[%s892_s3 + $0x38] sm:$0xff]  ;;  %v29_v16 = vld [vmem:[%s889_s0 + $0x40] sm:$0xff]  ;;  %v250_v17 = vld [vmem:[%s892_s3 + $0x30] sm:$0xff] }
   0x7   :  { %584 = vmatprep.mubr.msk.f32.mxu0 %vm46_vm1, %v23_v4  ;;  %606 = vmatpush3.msk.msra.mxu0 %vm313_vm2, %v256_v6  ;;  %v30_v18 = vld [vmem:[%s889_s0 + $0x48] sm:$0xff]  ;;  %v31_v20 = vld [vmem:[%s889_s0 + $0x50] sm:$0xff]  ;;  %v248_v21 = vld [vmem:[%s892_s3 + $0x20] sm:$0xff] }
   0x8   :  { %607 = vmatprep.subr.mxu0 %v255_v7  ;;  %656 = vmatprep.subr.mxu1 %v255_v7  ;;  %v249_v19 = vld [vmem:[%s892_s3 + $0x28] sm:$0xff]  ;;  %v32_v22 = vld [vmem:[%s889_s0 + $0x58] sm:$0xff]  ;;  %v33_v23 = vld [vmem:[%s889_s0 + $0x60] sm:$0xff] }
   0x9   :  { %608 = vmatpush3.msra.mxu0 %v255_v7  ;;  %669 = vmatpush3.msra.mxu1 %v255_v7  ;;  %v247_v24 = vld [vmem:[%s892_s3 + $0x18] sm:$0xff]  ;;  %v34_v25 = vld [vmem:[%s889_s0 + $0x68] sm:$0xff]  ;;  %v35_v26 = vld [vmem:[%s889_s0 + $0x70] sm:$0xff] }
   0xa   :  { %585 = vmatmul.mubr.msk.f32.gmra.mxu0 %vm46_vm1, %v24_v5  ;;  %609 = vmatprep.subr.mxu0 %v254_v9  ;;  %v36_v27 = vld [vmem:[%s889_s0 + $0x78] sm:$0xff]  ;;  %v246_v28 = vld [vmem:[%s892_s3 + $0x10] sm:$0xff]  ;;  %v245_v29 = vld [vmem:[%s892_s3 + $0x8] sm:$0xff] }
   0xb   :  { %587 = vmatprep.mubr.msk.f32.mxu0 %vm46_vm1, %v25_v8  ;;  %610 = vmatpush3.msra.mxu0 %v254_v9  ;;  %v244_v30 = vld [vmem:[%s892_s3] sm:$0xff] }
   0xc   :  { %611 = vmatprep.subr.mxu0 %v253_v11  ;;  %657 = vmatprep.subr.mxu1 %v254_v9  ;;  %v494_v32 = vld [vmem:[%s891_s2] ss:$0 sm:$0xff] }
   0xd   :  { %612 = vmatpush3.msra.mxu0 %v253_v11  ;;  %670 = vmatpush3.msra.mxu1 %v254_v9  ;;  %v512_v0 = vld [vmem:[%s893_s4] ss:$0 sm:$0xff] }
   0xe   :  { %588 = vmatmul.mubr.msk.f32.gmra.mxu0 %vm46_vm1, %v26_v10  ;;  %613 = vmatprep.subr.mxu0 %v252_v13 }
   0xf   :  { %590 = vmatprep.mubr.msk.f32.mxu0 %vm46_vm1, %v27_v12  ;;  %614 = vmatpush3.msra.mxu0 %v252_v13 }
  0x10   :  { %615 = vmatprep.subr.mxu0 %v251_v15  ;;  %658 = vmatprep.subr.mxu1 %v253_v11 }
  0x11   :  { %616 = vmatpush3.msra.mxu0 %v251_v15  ;;  %671 = vmatpush3.msra.mxu1 %v253_v11 }
  0x12   :  { %591 = vmatmul.mubr.msk.f32.gmra.mxu0 %vm46_vm1, %v28_v14  ;;  %617 = vmatprep.subr.mxu0 %v250_v17 }
  0x13   :  { %593 = vmatprep.mubr.msk.f32.mxu0 %vm46_vm1, %v29_v16  ;;  %618 = vmatpush3.msra.mxu0 %v250_v17 }
  0x14   :  { %619 = vmatprep.subr.mxu0 %v249_v19  ;;  %659 = vmatprep.subr.mxu1 %v252_v13 }
  0x15   :  { %620 = vmatpush3.msra.mxu0 %v249_v19  ;;  %672 = vmatpush3.msra.mxu1 %v252_v13 }
  0x16   :  { %594 = vmatmul.mubr.msk.f32.gmra.mxu0 %vm46_vm1, %v30_v18  ;;  %621 = vmatprep.subr.mxu0 %v248_v21 }
  0x17   :  { %596 = vmatprep.mubr.msk.f32.mxu0 %vm46_vm1, %v31_v20  ;;  %622 = vmatpush3.msra.mxu0 %v248_v21 }
  0x18   :  { %660 = vmatprep.subr.mxu1 %v251_v15  ;;  %623 = vmatprep.subr.mxu0 %v247_v24 }
  0x19   :  { %673 = vmatpush3.msra.mxu1 %v251_v15  ;;  %624 = vmatpush3.msra.mxu0 %v247_v24 }
  0x1a   :  { %597 = vmatmul.mubr.msk.f32.gmra.mxu0 %vm46_vm1, %v32_v22  ;;  %661 = vmatprep.subr.mxu1 %v250_v17 }
  0x1b   :  { %599 = vmatprep.mubr.msk.f32.mxu0 %vm46_vm1, %v33_v23  ;;  %674 = vmatpush3.msra.mxu1 %v250_v17 }
  0x1c   :  { %662 = vmatprep.subr.mxu1 %v249_v19  ;;  %625 = vmatprep.subr.mxu0 %v246_v28 }
  0x1d   :  { %675 = vmatpush3.msra.mxu1 %v249_v19  ;;  %626 = vmatpush3.msra.mxu0 %v246_v28 }
  0x1e   :  { %600 = vmatmul.mubr.msk.f32.gmra.mxu0 %vm46_vm1, %v34_v25  ;;  %663 = vmatprep.subr.mxu1 %v248_v21 }
  0x1f   :  { %602 = vmatprep.mubr.msk.f32.mxu0 %vm46_vm1, %v35_v26  ;;  %676 = vmatpush3.msra.mxu1 %v248_v21 }
  0x20   :  { %664 = vmatprep.subr.mxu1 %v247_v24  ;;  %627 = vmatprep.subr.mxu0 %v245_v29 }
  0x21   :  { %677 = vmatpush3.msra.mxu1 %v247_v24  ;;  %628 = vmatpush3.msra.mxu0 %v245_v29 }
  0x22   :  { %603 = vmatmul.mubr.msk.f32.gmra.mxu0 %vm46_vm1, %v36_v27  ;;  %665 = vmatprep.subr.mxu1 %v246_v28 }
  0x23   :  { %678 = vmatpush3.msra.mxu1 %v246_v28  ;;  %629 = vmatprep.subr.mxu0 %v244_v30 }
  0x24   :  { %666 = vmatprep.subr.mxu1 %v245_v29  ;;  %630 = vmatpush3.msra.mxu0 %v244_v30 }
  0x25   :  { %679 = vmatpush3.msra.mxu1 %v245_v29 }
  0x26   :  { %667 = vmatprep.subr.mxu1 %v244_v30 }
  0x27   :  { %680 = vmatpush3.msra.mxu1 %v244_v30 }
  0xc6   :  { %v583_v31 = vpop.f32.mrf.mxu0 }
  0xc7   :  { %v171_v35 = vadd.f32 %v583_v31, %v494_v32 }
  0xc8   :  { %v165_v33 = vpop.f32.mrf.mxu0 }
  0xc9   :  { %v166_v34 = vadd.f32 %v494_v32, %v165_v33 }
  0xca   :  { %v586_v36 = vpop.f32.mrf.mxu0 }
  0xcb   :  { %631 = vmatprep.mubr.msk.f32.mxu0 %vm264_vm3, %v166_v34  ;;  %v181_v39 = vadd.f32 %v586_v36, %v494_v32 }
  0xcc   :  { %v175_v37 = vpop.f32.mrf.mxu0  ;;  %632 = vmatmul.mubr.msk.f32.vlgmr.msra.gmra.mxu0 %vm264_vm3, %v171_v35 }
  0xcd   :  { %v176_v38 = vadd.f32 %v494_v32, %v175_v37 }
  0xce   :  { %v589_v40 = vpop.f32.mrf.mxu0 }
  0xcf   :  { %634 = vmatprep.mubr.msk.f32.mxu0 %vm264_vm3, %v176_v38  ;;  %v191_v43 = vadd.f32 %v589_v40, %v494_v32 }
  0xd0   :  { %v185_v41 = vpop.f32.mrf.mxu0  ;;  %635 = vmatmul.mubr.msk.f32.gmra.mxu0 %vm264_vm3, %v181_v39 }
  0xd1   :  { %v186_v42 = vadd.f32 %v494_v32, %v185_v41 }
  0xd2   :  { %v592_v44 = vpop.f32.mrf.mxu0 }
  0xd3   :  { %637 = vmatprep.mubr.msk.f32.mxu1 %vm264_vm3, %v186_v42  ;;  %v201_v47 = vadd.f32 %v592_v44, %v494_v32 }
  0xd4   :  { %v195_v45 = vpop.f32.mrf.mxu0  ;;  %638 = vmatmul.mubr.msk.f32.vlgmr.msra.gmra.mxu1 %vm264_vm3, %v191_v43 }
  0xd5   :  { %v196_v46 = vadd.f32 %v494_v32, %v195_v45 }
  0xd6   :  { %v595_v48 = vpop.f32.mrf.mxu0 }
  0xd7   :  { %640 = vmatprep.mubr.msk.f32.mxu1 %vm264_vm3, %v196_v46  ;;  %v211_v51 = vadd.f32 %v595_v48, %v494_v32 }
  0xd8   :  { %v205_v49 = vpop.f32.mrf.mxu0  ;;  %641 = vmatmul.mubr.msk.f32.gmra.mxu1 %vm264_vm3, %v201_v47 }
  0xd9   :  { %v206_v50 = vadd.f32 %v494_v32, %v205_v49 }
  0xda   :  { %v598_v52 = vpop.f32.mrf.mxu0 }
  0xdb   :  { %643 = vmatprep.mubr.msk.f32.mxu1 %vm264_vm3, %v206_v50  ;;  %v221_v55 = vadd.f32 %v598_v52, %v494_v32 }
  0xdc   :  { %v215_v53 = vpop.f32.mrf.mxu0  ;;  %644 = vmatmul.mubr.msk.f32.gmra.mxu1 %vm264_vm3, %v211_v51 }
  0xdd   :  { %v216_v54 = vadd.f32 %v494_v32, %v215_v53 }
  0xde   :  { %v601_v56 = vpop.f32.mrf.mxu0 }
  0xdf   :  { %646 = vmatprep.mubr.msk.f32.mxu1 %vm264_vm3, %v216_v54  ;;  %v231_v59 = vadd.f32 %v601_v56, %v494_v32 }
  0xe0   :  { %v225_v57 = vpop.f32.mrf.mxu0  ;;  %647 = vmatmul.mubr.msk.f32.gmra.mxu1 %vm264_vm3, %v221_v55 }
  0xe1   :  { %v226_v58 = vadd.f32 %v494_v32, %v225_v57 }
  0xe2   :  { %v604_v60 = vpop.f32.mrf.mxu0 }
  0xe3   :  { %649 = vmatprep.mubr.msk.f32.mxu1 %vm264_vm3, %v226_v58  ;;  %v241_v63 = vadd.f32 %v604_v60, %v494_v32 }
  0xe4   :  { %v235_v61 = vpop.f32.mrf.mxu0  ;;  %650 = vmatmul.mubr.msk.f32.gmra.mxu1 %vm264_vm3, %v231_v59 }
  0xe5   :  { %v236_v62 = vadd.f32 %v494_v32, %v235_v61 }
  0xe7   :  { %652 = vmatprep.mubr.msk.f32.mxu1 %vm264_vm3, %v236_v62 }
  0xe8   :  { %653 = vmatmul.mubr.msk.f32.gmra.mxu1 %vm264_vm3, %v241_v63 }
 0x18c   :  { %v633_v1 = vpop.f32.mrf.mxu0 }
 0x18d   :  { %v389_v2 = vadd.f32 %v633_v1, %v512_v0 }
 0x18e   :  { %v383_v3 = vpop.f32.mrf.mxu0 }
 0x18f   :  { %463 = vst.msk [vmem:[#allocation2 + $0x8] sm:$0xff] %vm46_vm1, %v389_v2  ;;  %v384_v4 = vadd.f32 %v512_v0, %v383_v3 }
 0x190   :  { %v636_v5 = vpop.f32.mrf.mxu0 }
 0x191   :  { %462 = vst.msk [vmem:[#allocation2] sm:$0xff] %vm46_vm1, %v384_v4  ;;  %v399_v6 = vadd.f32 %v636_v5, %v512_v0 }
 0x192   :  { %v393_v7 = vpop.f32.mrf.mxu0 }
 0x193   :  { %465 = vst.msk [vmem:[#allocation2 + $0x18] sm:$0xff] %vm46_vm1, %v399_v6  ;;  %v394_v8 = vadd.f32 %v512_v0, %v393_v7 }
 0x194   :  { %v639_v9 = vpop.f32.mrf.mxu1 }
 0x195   :  { %464 = vst.msk [vmem:[#allocation2 + $0x10] sm:$0xff] %vm46_vm1, %v394_v8  ;;  %v409_v10 = vadd.f32 %v639_v9, %v512_v0 }
 0x196   :  { %v403_v11 = vpop.f32.mrf.mxu1 }
 0x197   :  { %467 = vst.msk [vmem:[#allocation2 + $0x28] sm:$0xff] %vm46_vm1, %v409_v10  ;;  %v404_v12 = vadd.f32 %v512_v0, %v403_v11 }
 0x198   :  { %v642_v13 = vpop.f32.mrf.mxu1 }
 0x199   :  { %466 = vst.msk [vmem:[#allocation2 + $0x20] sm:$0xff] %vm46_vm1, %v404_v12  ;;  %v419_v14 = vadd.f32 %v642_v13, %v512_v0 }
 0x19a   :  { %v413_v15 = vpop.f32.mrf.mxu1 }
 0x19b   :  { %469 = vst.msk [vmem:[#allocation2 + $0x38] sm:$0xff] %vm46_vm1, %v419_v14  ;;  %v414_v16 = vadd.f32 %v512_v0, %v413_v15 }
 0x19c   :  { %v645_v17 = vpop.f32.mrf.mxu1 }
 0x19d   :  { %468 = vst.msk [vmem:[#allocation2 + $0x30] sm:$0xff] %vm46_vm1, %v414_v16  ;;  %v429_v18 = vadd.f32 %v645_v17, %v512_v0 }
 0x19e   :  { %v423_v19 = vpop.f32.mrf.mxu1 }
 0x19f   :  { %471 = vst.msk [vmem:[#allocation2 + $0x48] sm:$0xff] %vm46_vm1, %v429_v18  ;;  %v424_v20 = vadd.f32 %v512_v0, %v423_v19 }
 0x1a0   :  { %v648_v21 = vpop.f32.mrf.mxu1 }
 0x1a1   :  { %470 = vst.msk [vmem:[#allocation2 + $0x40] sm:$0xff] %vm46_vm1, %v424_v20  ;;  %v439_v22 = vadd.f32 %v648_v21, %v512_v0 }
 0x1a2   :  { %v433_v23 = vpop.f32.mrf.mxu1 }
 0x1a3   :  { %473 = vst.msk [vmem:[#allocation2 + $0x58] sm:$0xff] %vm46_vm1, %v439_v22  ;;  %v434_v24 = vadd.f32 %v512_v0, %v433_v23 }
 0x1a4   :  { %v651_v25 = vpop.f32.mrf.mxu1 }
 0x1a5   :  { %472 = vst.msk [vmem:[#allocation2 + $0x50] sm:$0xff] %vm46_vm1, %v434_v24  ;;  %v449_v26 = vadd.f32 %v651_v25, %v512_v0 }
 0x1a6   :  { %v443_v27 = vpop.f32.mrf.mxu1 }
 0x1a7   :  { %475 = vst.msk [vmem:[#allocation2 + $0x68] sm:$0xff] %vm46_vm1, %v449_v26  ;;  %v444_v28 = vadd.f32 %v512_v0, %v443_v27 }
 0x1a8   :  { %v654_v29 = vpop.f32.mrf.mxu1 }
 0x1a9   :  { %474 = vst.msk [vmem:[#allocation2 + $0x60] sm:$0xff] %vm46_vm1, %v444_v28  ;;  %v459_v30 = vadd.f32 %v654_v29, %v512_v0 }
 0x1aa   :  { %v453_v31 = vpop.f32.mrf.mxu1 }
 0x1ab   :  { %477 = vst.msk [vmem:[#allocation2 + $0x78] sm:$0xff] %vm46_vm1, %v459_v30  ;;  %v454_v32 = vadd.f32 %v512_v0, %v453_v31 }
 0x1ad   :  { %476 = vst.msk [vmem:[#allocation2 + $0x70] sm:$0xff] %vm46_vm1, %v454_v32 }
 0x1ae   :  { %482 = vsyncadd [#allocation3], 1792  ;;  %s706_s4 = smov [#allocation2]  }
 0x1af   :  { %s483_s28 = sshll.u32 %s706_s4, 4  ;;  %s484_s28 = int_to_ptr.vmem [resolvable:$true] %s483_s28 }
 0x1b0   :  { %s684_s29 = scalar_lea.vmem %s484_s28, 256  ;;  %s688_s30 = scalar_lea.vmem %s484_s28, 2048 }
 0x1b1   :  { %p685_p0 = scmp.ne.s32.totalorder %s484_s28, %s684_s29  ;;  %p689_p1 = scmp.lt.s32.totalorder %s484_s28, %s484_s28 }
 0x1b2   :  { %p690_p2 = scmp.lt.s32.totalorder %s688_s30, %s684_s29 }
 0x1b4   :  { %p691_p3 = por %p690_p2, %p689_p1 }
 0x1b6   :  { %p692_p4 = pnand %p691_p3, %p685_p0 }
 0x1b8   :  { %695 = shalt.err (!%p692_p4)
}
 0x1b9   :  { %s707_s6 = smov 128   ;;  %s708_s7 = smov 8  }
 0x1ba   :  { %489 = dma.vmem_to_hbm [thread:$0]  %s484_s28, 256, %s894_s5, [#allocation3], %s707_s6, %s707_s6, %s708_s7  }
 0x1bb   :  { %704 = dma.done.wait [#allocation3], 2048  }
 0x1bc   :  { %705 = vsyncadd [#allocation3], 4294965248 }
 0x1bd   :  { %493 = vsyncpa [#allocation3], 1 }

</bundles_post_ra>
